<compile_context>
chip_gen: v7x
topology: tpu7x:2x2x1
jax: 0.10.0
libtpu: 0.0.40
codegen_flags: <defaults>
</compile_context>

<pallas_src>
import functools

import jax
import jax.numpy as jnp
from jax.experimental import pallas as pl
from jax.experimental.pallas import tpu as pltpu

_LANE = 128   # lane width (last-dim tiling unit)
_SUBLANE = 8  # f32 sublane tiling unit (second-to-last dim)


def _round_up(x: int, m: int) -> int:
    return ((x + m - 1) // m) * m


def _mlp_kernel(x_ref, w1_ref, b1_ref, w2_ref, b2_ref, w3_ref, b3_ref, o_ref):
    # One batch tile, all three layers fused; intermediates never touch HBM.
    # bf16 operands -> native MXU passes; f32 accumulation; f32 VPU epilogues.
    x = x_ref[...].astype(jnp.bfloat16)

    h1 = jnp.dot(x, w1_ref[...], preferred_element_type=jnp.float32) + b1_ref[...]
    h1 = jnp.maximum(h1, 0.0)

    h2 = jnp.dot(h1.astype(jnp.bfloat16), w2_ref[...],
                 preferred_element_type=jnp.float32) + b2_ref[...]
    h2 = jnp.maximum(h2, 0.0)

    out = jnp.dot(h2.astype(jnp.bfloat16), w3_ref[...],
                  preferred_element_type=jnp.float32) + b3_ref[...]
    o_ref[...] = out.astype(o_ref.dtype)


def prepare_params(w1, b1, w2, b2, w3, b3):
    """One-time parameter prep, done at init time (NOT per forward call).

    Weights are stored (in_features, out_features) so the kernel computes
    y = x @ W + b (equivalent to PyTorch's x @ W.T with its (out, in) layout).
    Only the hidden dim is padded to a lane multiple (no-op for hidden=256);
    input/output feature dims stay unpadded (full-dim blocks are legal).
    Weights are cast to bf16 (MXU operands); biases stay f32 (1, N) rows.
    """
    hid = w1.shape[1]
    hid_p = _round_up(hid, _LANE)

    def _pad2(a, shape):
        pads = [(0, t - s) for s, t in zip(a.shape, shape)]
        return a if all(p == (0, 0) for p in pads) else jnp.pad(a, pads)

    w1p = _pad2(w1, (w1.shape[0], hid_p)).astype(jnp.bfloat16)
    b1p = _pad2(b1.reshape(1, -1), (1, hid_p)).astype(jnp.float32)
    w2p = _pad2(w2, (hid_p, hid_p)).astype(jnp.bfloat16)
    b2p = _pad2(b2.reshape(1, -1), (1, hid_p)).astype(jnp.float32)
    w3p = _pad2(w3, (hid_p, w3.shape[1])).astype(jnp.bfloat16)
    b3p = b3.reshape(1, -1).astype(jnp.float32)
    return (w1p, b1p, w2p, b2p, w3p, b3p)


@functools.partial(jax.jit, static_argnames=("block_batch",))
def mlp_forward(x, params, *, block_batch: int = 2048):
    """Fused MLP forward.  x: (B, in_features) f32; params from prepare_params."""
    w1p, b1p, w2p, b2p, w3p, b3p = params
    B, in_f = x.shape
    hid_p = w1p.shape[1]
    out_f = w3p.shape[1]

    # Batch tile: big tiles amortize the ~0.35us/step grid overhead; for
    # B <= 2*block_batch split into (at least) 2 steps so v7x's second
    # TensorCore gets work on the 'parallel' axis.  Always a sublane multiple.
    if B >= 2 * block_batch:
        tb = block_batch
    else:
        tb = max(_SUBLANE, min(block_batch, _round_up(pl.cdiv(B, 2), _SUBLANE)))
    b_pad = _round_up(B, tb)

    xp = x if b_pad == B else jnp.pad(x, ((0, b_pad - B), (0, 0)))
    grid = (b_pad // tb,)

    out = pl.pallas_call(
        _mlp_kernel,
        out_shape=jax.ShapeDtypeStruct((b_pad, out_f), x.dtype),
        grid_spec=pltpu.PrefetchScalarGridSpec(
            num_scalar_prefetch=0,
            grid=grid,
            in_specs=[
                # Activations: tiled over batch only; feature dim unpadded
                # (block last dim == full array dim is legal).
                pl.BlockSpec((tb, in_f), lambda i: (i, 0)),
                # Weights / biases: full arrays, VMEM-resident (constant maps).
                pl.BlockSpec((in_f, hid_p), lambda i: (0, 0)),
                pl.BlockSpec((1, hid_p), lambda i: (0, 0)),
                pl.BlockSpec((hid_p, hid_p), lambda i: (0, 0)),
                pl.BlockSpec((1, hid_p), lambda i: (0, 0)),
                pl.BlockSpec((hid_p, out_f), lambda i: (0, 0)),
                pl.BlockSpec((1, out_f), lambda i: (0, 0)),
            ],
            # Unpadded output: (tb, 3) rows are contiguous in HBM.
            out_specs=pl.BlockSpec((tb, out_f), lambda i: (i, 0)),
        ),
        compiler_params=pltpu.CompilerParams(
            dimension_semantics=("parallel",),
            # Working set at tb=2048 is ~8 MiB (double-buffered x/out tiles,
            # two (tb, 256) f32 intermediates, ~150 KiB of bf16 weights);
            # 32 MiB lifts v5e's 16 MiB scoped default and leaves headroom on
            # v7x's 64 MiB physical VMEM.
            vmem_limit_bytes=32 * 1024 * 1024,
        ),
    )(xp, w1p, b1p, w2p, b2p, w3p, b3p)

    return out if b_pad == B else out[:B]


# TODO(synk): action_probabilities (legal-action masking + softmax) and the
# training loop are host-side / framework logic, not part of the forward pass;
# they are intentionally not implemented as Pallas kernels.


def _reference(x, w1, b1, w2, b2, w3, b3):
    h1 = jnp.maximum(x @ w1 + b1, 0.0)
    h2 = jnp.maximum(h1 @ w2 + b2, 0.0)
    return h2 @ w3 + b3


if __name__ == "__main__":
    B, IN, HID, OUT = 16, 30, 256, 3

    key = jax.random.PRNGKey(0)
    kx, k1, k2, k3, k4, k5, k6 = jax.random.split(key, 7)

    x = jax.random.normal(kx, (B, IN), jnp.float32)

    def _init(k, shape, fan_in):
        bound = 1.0 / jnp.sqrt(fan_in)
        return jax.random.uniform(k, shape, jnp.float32, -bound, bound)

    # Weights stored as (in_features, out_features); equivalent to PyTorch's
    # (out, in) weight used as x @ W.T.
    w1 = _init(k1, (IN, HID), IN)
    b1 = _init(k2, (HID,), IN)
    w2 = _init(k3, (HID, HID), HID)
    b2 = _init(k4, (HID,), HID)
    w3 = _init(k5, (HID, OUT), HID)
    b3 = _init(k6, (OUT,), HID)

    params = prepare_params(w1, b1, w2, b2, w3, b3)  # one-time, off the hot path

    y = mlp_forward(x, params)
    y = jax.block_until_ready(y)

    y_ref = _reference(x, w1, b1, w2, b2, w3, b3)
    assert y.shape == (B, OUT), y.shape
    # bf16 MXU operands with f32 accumulation: small rounding error expected.
    assert jnp.allclose(y, y_ref, rtol=2e-2, atol=2e-2), (
        float(jnp.max(jnp.abs(y - y_ref)))
    )

    print("KERNEL_OK")
</pallas_src>

<mosaic_0001>
module attributes {stable_mosaic.version = 11 : i64} {
  func.func @_mlp_kernel(%arg0: i32, %arg1: memref<8x30xf32, #tpu.memory_space<vmem>>, %arg2: memref<30x256xbf16, #tpu.memory_space<vmem>>, %arg3: memref<1x256xf32, #tpu.memory_space<vmem>>, %arg4: memref<256x256xbf16, #tpu.memory_space<vmem>>, %arg5: memref<1x256xf32, #tpu.memory_space<vmem>>, %arg6: memref<256x3xbf16, #tpu.memory_space<vmem>>, %arg7: memref<1x3xf32, #tpu.memory_space<vmem>>, %arg8: memref<8x3xf32, #tpu.memory_space<vmem>>) attributes {dimension_semantics = [#tpu.dimension_semantics<parallel>], iteration_bounds = array<i64: 2>, scalar_prefetch = 0 : i64, scratch_operands = 0 : i64, tpu.core_type = #tpu.core_type<tc>, window_params = [{transform_indices = @transform_0, window_bounds = array<i64: 8, 30>}, {pipeline_mode = #tpu.pipeline_mode<synchronous>, transform_indices = @transform_1, window_bounds = array<i64: 30, 256>}, {pipeline_mode = #tpu.pipeline_mode<synchronous>, transform_indices = @transform_2, window_bounds = array<i64: 1, 256>}, {pipeline_mode = #tpu.pipeline_mode<synchronous>, transform_indices = @transform_3, window_bounds = array<i64: 256, 256>}, {pipeline_mode = #tpu.pipeline_mode<synchronous>, transform_indices = @transform_4, window_bounds = array<i64: 1, 256>}, {pipeline_mode = #tpu.pipeline_mode<synchronous>, transform_indices = @transform_5, window_bounds = array<i64: 256, 3>}, {pipeline_mode = #tpu.pipeline_mode<synchronous>, transform_indices = @transform_6, window_bounds = array<i64: 1, 3>}, {transform_indices = @transform_7, window_bounds = array<i64: 8, 3>}]} {
    %c0 = arith.constant 0 : index
    %c0_0 = arith.constant 0 : index
    %0 = vector.load %arg1[%c0, %c0_0] : memref<8x30xf32, #tpu.memory_space<vmem>>, vector<8x30xf32>
    %1 = arith.truncf %0 : vector<8x30xf32> to vector<8x30xbf16>
    %c0_1 = arith.constant 0 : index
    %c0_2 = arith.constant 0 : index
    %2 = vector.load %arg2[%c0_1, %c0_2] : memref<30x256xbf16, #tpu.memory_space<vmem>>, vector<30x256xbf16>
    %cst = arith.constant dense<0.000000e+00> : vector<8x256xf32>
    %3 = tpu.matmul %1, %2, %cst {dimension_numbers = #tpu.dot_dimension_numbers<[1], [0], [0], [1], [0, 0, 1, 1], [], []>} : vector<8x30xbf16>, vector<30x256xbf16>, vector<8x256xf32> -> vector<8x256xf32>
    %c0_3 = arith.constant 0 : index
    %c0_4 = arith.constant 0 : index
    %4 = vector.load %arg3[%c0_3, %c0_4] : memref<1x256xf32, #tpu.memory_space<vmem>>, vector<1x256xf32>
    %5 = vector.broadcast %4 : vector<1x256xf32> to vector<8x256xf32>
    %6 = arith.addf %3, %5 : vector<8x256xf32>
    %cst_5 = arith.constant 0.000000e+00 : f32
    %7 = vector.broadcast %cst_5 : f32 to vector<8x256xf32>
    %8 = arith.maximumf %6, %7 : vector<8x256xf32>
    %9 = arith.truncf %8 : vector<8x256xf32> to vector<8x256xbf16>
    %c0_6 = arith.constant 0 : index
    %c0_7 = arith.constant 0 : index
    %10 = vector.load %arg4[%c0_6, %c0_7] : memref<256x256xbf16, #tpu.memory_space<vmem>>, vector<256x256xbf16>
    %cst_8 = arith.constant dense<0.000000e+00> : vector<8x256xf32>
    %11 = tpu.matmul %9, %10, %cst_8 {dimension_numbers = #tpu.dot_dimension_numbers<[1], [0], [0], [1], [0, 0, 1, 1], [], []>} : vector<8x256xbf16>, vector<256x256xbf16>, vector<8x256xf32> -> vector<8x256xf32>
    %c0_9 = arith.constant 0 : index
    %c0_10 = arith.constant 0 : index
    %12 = vector.load %arg5[%c0_9, %c0_10] : memref<1x256xf32, #tpu.memory_space<vmem>>, vector<1x256xf32>
    %13 = vector.broadcast %12 : vector<1x256xf32> to vector<8x256xf32>
    %14 = arith.addf %11, %13 : vector<8x256xf32>
    %cst_11 = arith.constant 0.000000e+00 : f32
    %15 = vector.broadcast %cst_11 : f32 to vector<8x256xf32>
    %16 = arith.maximumf %14, %15 : vector<8x256xf32>
    %17 = arith.truncf %16 : vector<8x256xf32> to vector<8x256xbf16>
    %c0_12 = arith.constant 0 : index
    %c0_13 = arith.constant 0 : index
    %18 = vector.load %arg6[%c0_12, %c0_13] : memref<256x3xbf16, #tpu.memory_space<vmem>>, vector<256x3xbf16>
    %cst_14 = arith.constant dense<0.000000e+00> : vector<8x3xf32>
    %19 = tpu.matmul %17, %18, %cst_14 {dimension_numbers = #tpu.dot_dimension_numbers<[1], [0], [0], [1], [0, 0, 1, 1], [], []>} : vector<8x256xbf16>, vector<256x3xbf16>, vector<8x3xf32> -> vector<8x3xf32>
    %c0_15 = arith.constant 0 : index
    %c0_16 = arith.constant 0 : index
    %20 = vector.load %arg7[%c0_15, %c0_16] : memref<1x3xf32, #tpu.memory_space<vmem>>, vector<1x3xf32>
    %21 = vector.broadcast %20 : vector<1x3xf32> to vector<8x3xf32>
    %22 = arith.addf %19, %21 : vector<8x3xf32>
    %c0_17 = arith.constant 0 : index
    %c0_18 = arith.constant 0 : index
    %23 = vector.load %arg8[%c0_17, %c0_18] : memref<8x3xf32, #tpu.memory_space<vmem>>, vector<8x3xf32>
    tpu.vector_store %arg8[%c0_17, %c0_18], %22 {strides = array<i32>} : memref<8x3xf32, #tpu.memory_space<vmem>>, vector<8x3xf32>,
    return
  }
  func.func @transform_0(%arg0: i32) -> (i32, i32) {
    %c0_i32 = arith.constant 0 : i32
    %c0_i32_0 = arith.constant 0 : i32
    return %arg0, %c0_i32 : i32, i32
  }
  func.func @transform_1(%arg0: i32) -> (i32, i32) {
    %c0_i32 = arith.constant 0 : i32
    %c0_i32_0 = arith.constant 0 : i32
    %c0_i32_1 = arith.constant 0 : i32
    return %c0_i32, %c0_i32_0 : i32, i32
  }
  func.func @transform_2(%arg0: i32) -> (i32, i32) {
    %c0_i32 = arith.constant 0 : i32
    %c0_i32_0 = arith.constant 0 : i32
    %c0_i32_1 = arith.constant 0 : i32
    return %c0_i32, %c0_i32_0 : i32, i32
  }
  func.func @transform_3(%arg0: i32) -> (i32, i32) {
    %c0_i32 = arith.constant 0 : i32
    %c0_i32_0 = arith.constant 0 : i32
    %c0_i32_1 = arith.constant 0 : i32
    return %c0_i32, %c0_i32_0 : i32, i32
  }
  func.func @transform_4(%arg0: i32) -> (i32, i32) {
    %c0_i32 = arith.constant 0 : i32
    %c0_i32_0 = arith.constant 0 : i32
    %c0_i32_1 = arith.constant 0 : i32
    return %c0_i32, %c0_i32_0 : i32, i32
  }
  func.func @transform_5(%arg0: i32) -> (i32, i32) {
    %c0_i32 = arith.constant 0 : i32
    %c0_i32_0 = arith.constant 0 : i32
    %c0_i32_1 = arith.constant 0 : i32
    return %c0_i32, %c0_i32_0 : i32, i32
  }
  func.func @transform_6(%arg0: i32) -> (i32, i32) {
    %c0_i32 = arith.constant 0 : i32
    %c0_i32_0 = arith.constant 0 : i32
    %c0_i32_1 = arith.constant 0 : i32
    return %c0_i32, %c0_i32_0 : i32, i32
  }
  func.func @transform_7(%arg0: i32) -> (i32, i32) {
    %c0_i32 = arith.constant 0 : i32
    %c0_i32_0 = arith.constant 0 : i32
    return %arg0, %c0_i32 : i32, i32
  }
}

</mosaic_0001>

<bundles_post_ra>
// kernel: mlp_forward.1
= control target key start
LH: loop header
LB: loop body
LE: loop exit
PB: predicated region body
PF: predicated region fallthrough
CT: control target
= control target key end

     0   :  { %12 = vsyncpa [#allocation3], 0  ;;  %s1137_s24 = smov 0   ;;  %s1269_s0 = inlined_call_operand.vmem [shape: f32[16,30], index: 0, kind: input, shape index: {}]   ;;  %s1270_s1 = inlined_call_operand.vmem [shape: bf16[30,256], index: 1, kind: input, shape index: {}]   ;;  %s1271_s2 = inlined_call_operand.vmem [shape: f32[1,256], index: 2, kind: input, shape index: {}]   ;;  %s1272_s3 = inlined_call_operand.hbm [shape: bf16[256,256], index: 3, kind: input, shape index: {}]   ;;  %s1273_s4 = inlined_call_operand.vmem [shape: f32[1,256], index: 4, kind: input, shape index: {}]   ;;  %s1274_s5 = inlined_call_operand.vmem [shape: bf16[256,3], index: 5, kind: input, shape index: {}]   ;;  %s1275_s6 = inlined_call_operand.vmem [shape: f32[1,3], index: 6, kind: input, shape index: {}]   ;;  %s1276_s7 = inlined_call_operand.vmem [shape: f32[16,3], index: 7, kind: output, shape index: {}]  }
   0x1 LB: > { %s1143_s25 = sadd.s32 4294967295, %s1091_s24   ;;  %p875_p0 = scmp.ge.s32.totalorder %s1091_s24, 1  ;;  %s1091_s24 = sphi %s1137_s24, %s18_s24  }
   0x2   : > { %p201_p1 = scmp.lt.s32.totalorder %s1091_s24, 3  ;;  %s1093_s26 = smov [#allocation2]  }
   0x3   : > { %s219_s27 = sshll.u32 %s1093_s26, 4  ;;  %p1277_p3 = scmp.eq.s32.totalorder %s1143_s25, 0  ;;  %s220_s27 = int_to_ptr.vmem [resolvable:$true] %s219_s27 }
   0x4   : > { %p1147_p2 = pnand %p875_p0, %p201_p1  ;;  %s1053_s9 = scalar_lea.hbm %s1272_s3, 4096 }
   0x5   : > { %p1054_p6 = scmp.ne.s32.totalorder %s1272_s3, %s1053_s9  ;;  %p1060_p10 = scmp.lt.u32.totalorder %s1053_s9, %s1272_s3 }
   0x6   : > { %s1279_s28 = scalar_select %p1147_p2, 1, 0 }
   0x7   : > { %p965_p4 = pneg %p1147_p2 }
   0x9   : > { %p1156_p5 = pnand %p1277_p3, %p965_p4 }
   0xb   : > { %p1055_p7 = pneg %p1156_p5 }
   0xd   : > { %p1056_p8 = pnand %p1055_p7, %p1054_p6 }
   0xf   : > { %p1057_p9 = pneg %p1056_p8 }
  0x11   : > { %p1062_p11 = pnand %p1060_p10, %p1057_p9 }
  0x13   : > { %1065 = shalt.err (!%p1062_p11)
}
  0x14   : > { %s1066_s14 = scalar_lea.vmem %s220_s27, 4096  ;;  %p1074_p1 = scmp.lt.s32.totalorder %s220_s27, %s220_s27 }
  0x15   : > { %p1067_p12 = scmp.ne.s32.totalorder %s220_s27, %s1066_s14  ;;  %p1075_p4 = scmp.lt.s32.totalorder %s1066_s14, %s1066_s14 }
  0x17   : > { %p1069_p13 = pnand %p1067_p12, %p1055_p7  ;;  %p1076_p3 = por %p1075_p4, %p1074_p1 }
  0x19   : > { %p1070_p0 = pneg %p1069_p13 }
  0x1b   : > { %p1077_p2 = pnand %p1076_p3, %p1070_p0 }
  0x1d   : > { %1080 = shalt.err (!%p1077_p2)
}
  0x1e   : > { %s1094_s15 = smov 128   ;;  %s1095_s16 = smov 8  }
  0x1f   : > { %968 = dma.hbm_to_vmem [thread:$0]  (!%p1156_p5), %s1272_s3, 4096, %s220_s27, [#allocation3], %s1094_s15, %s1094_s15, %s1095_s16  }
  0x20   : > { %p1281_p6 = scmp.ne.s32.totalorder %s1279_s28, 0 }
  0x21   : > { %p1282_p8 = scmp.eq.s32.totalorder (!%p1281_p6), %s1143_s25, 0 }
  0x22   : > { %251 = sbr.rel (%p1281_p6) target bundleno = 709 (0x2c5), region = 48 }
  0x29   : > { %1086 = dma.done.wait (%p1282_p8), [#allocation3], 4096   ;;  %p1283_p7 = pmov %p1282_p8 }
  0x2a   : > { %p281_p2 = scmp.lt.s32.totalorder %s1143_s25, 1  ;;  %v1096_v0 = vmov 0   ;;  %v983_v1 = vld [vmem:[%s1270_s1 + $0x4] ss:$8 sps:$4 sm:$0xff]   ;;  %v985_v2 = vld [vmem:[%s1270_s1] ss:$8 sps:$4 sm:$0xff]   ;;  %v298_v52 = vlaneseq }
  0x2b   : > { %1088 = vsyncadd (%p1283_p7), [#allocation3], 4294963200  ;;  %369 = vmatprep.mubr.bf16.mxu0 %v1096_v0  ;;  %vm330_vm0 = vcmask 1046528   ;;  %337 = vmatprep.subr.bf16.mxu0 %v983_v1  ;;  %v986_v3 = vld [vmem:[%s1270_s1 + $0x14] ss:$8 sps:$4 sm:$0x7f]  }
  0x2c   : > { %s1285_s25 = smov (!%p281_p2, %s1143_s25), 1  ;;  %v988_v4 = vld [vmem:[%s1270_s1 + $0x10] ss:$8 sps:$4 sm:$0x7f]   ;;  %338 = vmatpush1.bf16.msra.mxu0 %v985_v2  ;;  %v989_v7 = vld [vmem:[#allocation2 + $0x4] ss:$8 sps:$4 sm:$0xff]  }
  0x2d   : > { %s880_s19 = sshll.u32 %s1285_s25, 3  ;;  %886 = vmatprep.subr.msk.bf16.mxu0 %vm330_vm0, %v986_v3  ;;  %v332_v6 = vsel %vm330_vm0, %v988_v4, 0  ;;  %v991_v8 = vld [vmem:[#allocation2] ss:$8 sps:$4 sm:$0xff]   ;;  %v992_v9 = vld [vmem:[#allocation2 + $0x14] ss:$8 sps:$4 sm:$0xff]   ;;  %586 = vmatprep.subr.bf16.mxu1 %v989_v7 }
  0x2e   : > { %s284_s26 = scalar_lea.vmem %s1269_s0, %s880_s19  ;;  %vm326_vm1 = vcmask 244736   ;;  %587 = vmatpush1.bf16.msra.mxu1 %v991_v8  ;;  %v994_v11 = vld [vmem:[#allocation2 + $0x10] ss:$8 sps:$4 sm:$0xff]   ;;  %v995_v12 = vld [vmem:[#allocation2 + $0x24] ss:$8 sps:$4 sm:$0xff]   ;;  %v299_v53 = vshrl.u32 %v298_v52, 7  ;;  %s288_s10 = scalar_lea.vmem %s1276_s7, %s880_s19 }
  0x2f   : > { %v290_v5 = vld [vmem:[%s284_s26] sm:$0xff]  ;;  %588 = vmatprep.subr.bf16.mxu1 %v992_v9  ;;  %v998_v14 = vld [vmem:[#allocation2 + $0x34] ss:$8 sps:$4 sm:$0xff]   ;;  %v1000_v15 = vld [vmem:[#allocation2 + $0x30] ss:$8 sps:$4 sm:$0xff]   ;;  %vm806_vm2 = vcmask 23552  }
  0x30   : > { %v291_v10 = vpack.c.bf16 %v290_v5, %v290_v5  ;;  %340 = vmatpush1.bf16.msra.mxu0 %v332_v6  ;;  %v997_v13 = vld [vmem:[#allocation2 + $0x20] ss:$8 sps:$4 sm:$0xff]   ;;  %v1001_v16 = vld [vmem:[#allocation2 + $0x44] ss:$8 sps:$4 sm:$0xff]   ;;  %v1004_v18 = vld [vmem:[#allocation2 + $0x54] ss:$8 sps:$4 sm:$0xff]  }
  0x31   : > { %v1003_v17 = vld [vmem:[#allocation2 + $0x40] ss:$8 sps:$4 sm:$0xff]   ;;  %v1006_v19 = vld [vmem:[#allocation2 + $0x50] ss:$8 sps:$4 sm:$0xff]   ;;  %v1007_v20 = vld [vmem:[#allocation2 + $0x64] ss:$8 sps:$4 sm:$0xff]  }
  0x32   : > { %589 = vmatpush1.bf16.msra.mxu1 %v994_v11  ;;  %v1009_v21 = vld [vmem:[#allocation2 + $0x60] ss:$8 sps:$4 sm:$0xff]   ;;  %v1010_v22 = vld [vmem:[#allocation2 + $0x74] ss:$8 sps:$4 sm:$0xff]   ;;  %v1012_v23 = vld [vmem:[#allocation2 + $0x70] ss:$8 sps:$4 sm:$0xff]  }
  0x33   : > { %887 = vmatmul.mubr.msk.bf16.vlgmr.msra.gmra.mrb[0].mxu0 %vm326_vm1, %v291_v10  ;;  %590 = vmatprep.subr.bf16.mxu1 %v995_v12  ;;  %v1013_v24 = vld [vmem:[#allocation2 + $0x84] ss:$8 sps:$4 sm:$0xff]   ;;  %v1015_v25 = vld [vmem:[#allocation2 + $0x80] ss:$8 sps:$4 sm:$0xff]   ;;  %v1016_v26 = vld [vmem:[#allocation2 + $0x94] ss:$8 sps:$4 sm:$0xff]  }
  0x34   : > { %v1018_v27 = vld [vmem:[#allocation2 + $0x90] ss:$8 sps:$4 sm:$0xff]   ;;  %v1019_v28 = vld [vmem:[#allocation2 + $0xa4] ss:$8 sps:$4 sm:$0xff]   ;;  %v1021_v29 = vld [vmem:[#allocation2 + $0xa0] ss:$8 sps:$4 sm:$0xff]  }
  0x35   : > { %v1022_v30 = vld [vmem:[#allocation2 + $0xb4] ss:$8 sps:$4 sm:$0xff]   ;;  %v1024_v31 = vld [vmem:[#allocation2 + $0xb0] ss:$8 sps:$4 sm:$0xff]   ;;  %v1025_v32 = vld [vmem:[#allocation2 + $0xc4] ss:$8 sps:$4 sm:$0xff]  }
  0x36   : > { %591 = vmatpush1.bf16.msra.mxu1 %v997_v13  ;;  %v1027_v33 = vld [vmem:[#allocation2 + $0xc0] ss:$8 sps:$4 sm:$0xff]   ;;  %v1028_v34 = vld [vmem:[#allocation2 + $0xd4] ss:$8 sps:$4 sm:$0xff]   ;;  %v1030_v35 = vld [vmem:[#allocation2 + $0xd0] ss:$8 sps:$4 sm:$0xff]  }
  0x37   : > { %592 = vmatprep.subr.bf16.mxu1 %v998_v14  ;;  %v1031_v36 = vld [vmem:[#allocation2 + $0xe4] ss:$8 sps:$4 sm:$0xff]   ;;  %v1033_v37 = vld [vmem:[#allocation2 + $0xe0] ss:$8 sps:$4 sm:$0xff]   ;;  %v1034_v38 = vld [vmem:[#allocation2 + $0xf4] ss:$8 sps:$4 sm:$0xff]  }
  0x38   : > { %v1036_v39 = vld [vmem:[#allocation2 + $0xf0] ss:$8 sps:$4 sm:$0xff]   ;;  %v1037_v40 = vld [vmem:[%s1274_s5 + $0x40] sm:$0xff]   ;;  %v1039_v42 = vld [vmem:[%s1274_s5 + $0x48] sm:$0xff]   ;;  %v300_v54 = vsub.s32 0, %v299_v53  ;;  %v304_v56 = vsub.s32 1, %v299_v53 }
  0x39   : > { %v1038_v41 = vld [vmem:[%s1274_s5] sm:$0xff]   ;;  %939 = vmatprep.subr.bf16.mxu0 %v1037_v40  ;;  %v1040_v43 = vld [vmem:[%s1274_s5 + $0x8] sm:$0xff]   ;;  %v1041_v44 = vld [vmem:[%s1274_s5 + $0x50] sm:$0xff]  }
  0x3a   : > { %593 = vmatpush1.bf16.msra.mxu1 %v1000_v15  ;;  %940 = vmatpush3.bf16.msra.mxu0 %v1038_v41  ;;  %v1042_v45 = vld [vmem:[%s1274_s5 + $0x10] sm:$0xff]   ;;  %v1043_v46 = vld [vmem:[%s1274_s5 + $0x58] sm:$0xff]   ;;  %v1045_v48 = vld [vmem:[%s1274_s5 + $0x60] sm:$0xff]  }
  0x3b   : > { %594 = vmatprep.subr.bf16.mxu1 %v1001_v16  ;;  %941 = vmatprep.subr.bf16.mxu0 %v1039_v42  ;;  %v1044_v47 = vld [vmem:[%s1274_s5 + $0x18] sm:$0xff]   ;;  %v1046_v49 = vld [vmem:[%s1274_s5 + $0x20] sm:$0xff]   ;;  %v1047_v50 = vld [vmem:[%s1274_s5 + $0x68] sm:$0xff]  }
  0x3c   : > { %v1048_v51 = vld [vmem:[%s1274_s5 + $0x28] sm:$0xff]   ;;  %v296_v55 = vld [vmem:[%s1271_s2] sm:$0x3]  ;;  %v1049_v5 = vld [vmem:[%s1274_s5 + $0x70] sm:$0xff]  }
  0x3d   : > { %v301_v57 = vrot.slane %v296_v55, %v300_v54  ;;  %v305_v58 = vrot.slane %v296_v55, %v304_v56  ;;  %v1050_v6 = vld [vmem:[%s1274_s5 + $0x30] sm:$0xff]   ;;  %v1051_v7 = vld [vmem:[%s1274_s5 + $0x78] sm:$0xff]   ;;  %v414_v9 = vld [vmem:[%s1273_s4] sm:$0x3] }
  0x3e   : > { %595 = vmatpush1.bf16.msra.mxu1 %v1003_v17  ;;  %942 = vmatpush3.bf16.msra.mxu0 %v1040_v43  ;;  %v1052_v8 = vld [vmem:[%s1274_s5 + $0x38] sm:$0xff]   ;;  %v419_v10 = vrot.slane %v414_v9, %v300_v54  ;;  %v423_v11 = vrot.slane %v414_v9, %v304_v56 }
  0x3f   : > { %596 = vmatprep.subr.bf16.mxu1 %v1004_v18  ;;  %943 = vmatprep.subr.bf16.mxu0 %v1041_v44 }
  0x42   : > { %597 = vmatpush1.bf16.msra.mxu1 %v1006_v19  ;;  %944 = vmatpush3.bf16.msra.mxu0 %v1042_v45 }
  0x43   : > { %598 = vmatprep.subr.bf16.mxu1 %v1007_v20  ;;  %945 = vmatprep.subr.bf16.mxu0 %v1043_v46 }
  0x46   : > { %599 = vmatpush1.bf16.msra.mxu1 %v1009_v21  ;;  %946 = vmatpush3.bf16.msra.mxu0 %v1044_v47 }
  0x47   : > { %600 = vmatprep.subr.bf16.mxu1 %v1010_v22  ;;  %947 = vmatprep.subr.bf16.mxu0 %v1045_v48 }
  0x4a   : > { %601 = vmatpush1.bf16.msra.mxu1 %v1012_v23  ;;  %948 = vmatpush3.bf16.msra.mxu0 %v1046_v49  ;;  %v920_v23 = vld [vmem:[%s1275_s6] ss:$0 sm:$0xff] }
  0x4b   : > { %602 = vmatprep.subr.bf16.mxu1 %v1013_v24  ;;  %949 = vmatprep.subr.bf16.mxu0 %v1047_v50 }
  0x4e   : > { %603 = vmatpush1.bf16.msra.mxu1 %v1015_v25  ;;  %950 = vmatpush3.bf16.msra.mxu0 %v1048_v51 }
  0x4f   : > { %604 = vmatprep.subr.bf16.mxu1 %v1016_v26  ;;  %951 = vmatprep.subr.bf16.mxu0 %v1049_v5 }
  0x52   : > { %605 = vmatpush1.bf16.msra.mxu1 %v1018_v27  ;;  %952 = vmatpush3.bf16.msra.mxu0 %v1050_v6 }
  0x53   : > { %606 = vmatprep.subr.bf16.mxu1 %v1019_v28  ;;  %953 = vmatprep.subr.bf16.mxu0 %v1051_v7 }
  0x56   : > { %607 = vmatpush1.bf16.msra.mxu1 %v1021_v29  ;;  %954 = vmatpush3.bf16.msra.mxu0 %v1052_v8 }
  0x57   : > { %608 = vmatprep.subr.bf16.mxu1 %v1022_v30 }
  0x5a   : > { %609 = vmatpush1.bf16.msra.mxu1 %v1024_v31 }
  0x5b   : > { %610 = vmatprep.subr.bf16.mxu1 %v1025_v32 }
  0x5e   : > { %611 = vmatpush1.bf16.msra.mxu1 %v1027_v33 }
  0x5f   : > { %612 = vmatprep.subr.bf16.mxu1 %v1028_v34 }
  0x62   : > { %613 = vmatpush1.bf16.msra.mxu1 %v1030_v35 }
  0x63   : > { %614 = vmatprep.subr.bf16.mxu1 %v1031_v36 }
  0x66   : > { %615 = vmatpush1.bf16.msra.mxu1 %v1033_v37 }
  0x67   : > { %616 = vmatprep.subr.bf16.mxu1 %v1034_v38 }
  0x6a   : > { %617 = vmatpush1.bf16.msra.mxu1 %v1036_v39 }
 0x106   : > { %v371_v59 = vpop.f32.mrb[0].mxu0 }
 0x107   : > { %v372_v60 = vadd.f32 %v371_v59, %v301_v57  ;;  %v373_v61 = vpop.f32.mrb[1].mxu0 }
 0x108   : > { %v374_v62 = vadd.f32 %v373_v61, %v305_v58  ;;  %v375_v63 = vpop.f32.mrb[2].mxu0 }
 0x109   : > { %v378_v0 = vmax.f32 %v372_v60, 0.0  ;;  %v376_v1 = vpop.f32.mrb[3].mxu0 }
 0x10a   : > { %v379_v2 = vmax.f32 %v374_v62, 0.0 }
 0x10b   : > { %v380_v4 = vpack.c.bf16 %v378_v0, %v378_v0 }
 0x10c   : > { %v381_v3 = vpack.c.bf16 %v379_v2, %v379_v2 }
 0x10e   : > { %618 = vmatprep.mubr.bf16.mxu1 %v381_v3 }
 0x10f   : > { %619 = vmatmul.mubr.bf16.vlgmr.msra.gmra.mrb[0].mxu1 %v380_v4 }
 0x1e2   : > { %v620_v12 = vpop.f32.mrb[0].mxu1 }
 0x1e3   : > { %v621_v13 = vadd.f32 %v620_v12, %v419_v10  ;;  %v622_v14 = vpop.f32.mrb[1].mxu1 }
 0x1e4   : > { %v623_v15 = vadd.f32 %v622_v14, %v423_v11  ;;  %v624_v16 = vpop.f32.mrb[2].mxu1 }
 0x1e5   : > { %v627_v17 = vmax.f32 %v621_v13, 0.0  ;;  %v625_v18 = vpop.f32.mrb[3].mxu1 }
 0x1e6   : > { %v628_v19 = vmax.f32 %v623_v15, 0.0 }
 0x1e7   : > { %v629_v21 = vpack.c.bf16 %v627_v17, %v627_v17 }
 0x1e8   : > { %v630_v20 = vpack.c.bf16 %v628_v19, %v628_v19 }
 0x1ea   : > { %798 = vmatprep.mubr.bf16.mxu0 %v630_v20 }
 0x1eb   : > { %799 = vmatmul.mubr.bf16.vlgmr.msra.gmra.mrb[4].mxu0 %v629_v21 }
 0x2be   : > { %v955_v22 = vpop.f32.mrb[4].mxu0 }
 0x2bf   : > { %v956_v24 = vpop.f32.mrb[5].mxu0 }
 0x2c0   : > { %v957_v25 = vadd.f32 %v956_v24, %v955_v22  ;;  %v958_v26 = vpop.f32.mrb[6].mxu0 }
 0x2c1   : > { %v959_v27 = vpop.f32.mrb[7].mxu0 }
 0x2c2   : > { %v801_v28 = vadd.f32 %v957_v25, %v920_v23 }
 0x2c4   : > { %807 = vst.msk [vmem:[%s288_s10] sm:$0xff] %vm806_vm2, %v801_v28 }
 0x2c5 PF: > { %s18_s24 = sadd.s32 1, %s1091_s24  }
 0x2c6   : > { %p15_p3 = scmp.ge.s32.totalorder %s18_s24, 4  }
 0x2c8   :  { %17 = sbr.rel (!%p15_p3) target bundleno = 1 (0x1), region = 83 }
 0x2cf   :  { %827 = vsyncpa [#allocation3], 1 }
 0x2d0   :  { %829 = vsyncpa [#allocation3 + $0x1], 1 }

</bundles_post_ra>
